<compile_context>
chip_gen: v7x
topology: tpu7x:2x2x1
jax: 0.10.0
libtpu: 0.0.40
codegen_flags: <defaults>
</compile_context>

<pallas_src>
import functools

import numpy as np
import jax
import jax.numpy as jnp
from jax.experimental import pallas as pl
from jax.experimental.pallas import tpu as pltpu

# ---- module constants (kernel='6' defaults of HelmholtzLoss.__init__) -------
_KERNEL_1D = np.array([1 / 90, -3 / 20, 3 / 2, -49 / 18, 3 / 2, -3 / 20, 1 / 90],
                      dtype=np.float64)
_N_K = 7                       # 7-tap stencil for kernel '6'
_PAD = 2                       # self.pad for kernel '6'  (F.pad of the conv output)
_CONV_PAD = 1                  # Conv2d(..., padding=1) in the torch module
_PAD_TOTAL = _PAD + _CONV_PAD  # stencil half-width relative to the output pixel = 3

_EPSILON, _MU, _OMEGA, _SIGMA = 50, 1e-4, 42, 0.1
_DX = 1.0 / 256.0
_WN_REAL = _EPSILON * _MU * _OMEGA ** 2          # 8.82
_WN_IMAG = -_SIGMA * _OMEGA                      # -4.2
_SCALE_REAL = float(_DX ** 2 * np.float32(_WN_REAL))
_SCALE_IMAG = float(_DX ** 2 * np.float32(_WN_IMAG))


# --------------------------- host-built constants -----------------------------
def _row_band_matrix(h, tb):
    """Block-diagonal (TB*H, TB*H) ones-band: per-plane sum of the 7 stencil rows,
    with the 2-px F.pad border rows (and the conv's zero-pad rows) already folded in."""
    a = np.zeros((h, h), np.float32)
    for i in range(_PAD, h - _PAD):                       # interior output rows
        lo = max(0, i - _PAD_TOTAL)
        hi = min(h - 1, i + _PAD_TOTAL)
        a[i, lo:hi + 1] = 1.0
    return np.kron(np.eye(tb, dtype=np.float32), a)       # (tb*h, tb*h)


def _col_band_matrix(w, gain=2.0):
    """(W, W) band holding the 7-tap weights on the columns; border columns zeroed.
    `gain` folds the (pred_xx + pred_yy == 2*conv) factor into the constants."""
    b = np.zeros((w, w), np.float32)
    for j in range(_PAD, w - _PAD):                        # interior output cols
        for c in range(_N_K):
            m = j - _PAD_TOTAL + c
            if 0 <= m < w:
                b[m, j] = np.float32(gain * _KERNEL_1D[c])
    return b


def _scale_column(b, c, h):
    """(B*C*H, 1) per-row wave-number scale: real for even channels, imag for odd."""
    ch = np.arange(b * c) % c
    sc = np.where(ch % 2 == 0, _SCALE_REAL, _SCALE_IMAG).astype(np.float32)
    return np.repeat(sc, h).reshape(b * c * h, 1)


def _pick_tb(n, h, w, max_rows=512, max_block_bytes=1 << 20):
    """Largest plane-batch TB dividing N with TB*H a multiple of 8 and modest VMEM."""
    best = None
    for tb in range(1, n + 1):
        if n % tb:
            continue
        m = tb * h
        if m % 8 != 0 and tb != n:
            continue
        if m > max_rows or m * w * 4 > max_block_bytes or m * m * 4 > max_block_bytes:
            continue
        best = tb
    if best is None:
        best = n          # full-array block: always a legal block shape
    return best


# ----------------------------- Pallas kernel ---------------------------------
def _helmholtz_loss_kernel(pred_ref, targ_ref, scale_ref, a_ref, b_ref,
                           out_ref, acc_ref, *, inv_count):
    g = pl.program_id(0)

    @pl.when(g == 0)
    def _init():
        acc_ref[...] = jnp.zeros_like(acc_ref)
        out_ref[...] = jnp.zeros_like(out_ref)

    # d = pred - target, computed in VMEM (halves both HBM reads of the stencil
    # pipeline and the stencil work itself, by linearity of the operator).
    d = pred_ref[...] - targ_ref[...]                                   # (M, W)

    # Separable 7x7 "conv" + F.pad(2) border zeroing as two MXU matmuls:
    #   q = A_big @ d @ (2*B_col)   (A_big block-diag ones band, B_col 7-tap band,
    #                                factor 2 pre-folded into B_col on the host)
    rowsum = jnp.dot(a_ref[...], d, preferred_element_type=jnp.float32)  # (M, W)
    q = jnp.dot(rowsum, b_ref[...], preferred_element_type=jnp.float32)  # (M, W)

    # helmholtz(pred) - helmholtz(target) == 2*conv(d) + dx^2 * wn * d
    hd = q + scale_ref[...] * d
    acc_ref[...] = acc_ref[...] + hd * hd                                # VPU only

    @pl.when(g == pl.num_programs(0) - 1)
    def _finish():
        # sum_c (1/C) * MSE_per_channel == total_sqdiff / (C*B*H*W)
        total = jnp.sum(acc_ref[...]) * jnp.float32(inv_count)
        out_ref[...] = jnp.broadcast_to(total, (1, 1))


# ------------------------------ wrapper ---------------------------------------
def helmholtz_loss(pred, target):
    assert pred.shape == target.shape and pred.ndim == 4
    b, c, h, w = pred.shape
    n = b * c
    tb = _pick_tb(n, h, w)
    m = tb * h
    grid = n // tb

    # Free layout change: collapse (B, C, H, W) -> (B*C*H, W); no padding, no copies.
    pred2 = pred.astype(jnp.float32).reshape(n * h, w)
    targ2 = target.astype(jnp.float32).reshape(n * h, w)

    a_big = jnp.asarray(_row_band_matrix(h, tb))       # (m, m), constant per step
    b_col = jnp.asarray(_col_band_matrix(w))           # (w, w), constant per step
    scale_col = jnp.asarray(_scale_column(b, c, h))    # (n*h, 1)

    inv_count = 1.0 / float(c * b * h * w)
    kernel = functools.partial(_helmholtz_loss_kernel, inv_count=inv_count)

    out = pl.pallas_call(
        kernel,
        out_shape=jax.ShapeDtypeStruct((1, 1), jnp.float32),
        grid=(grid,),
        in_specs=[
            pl.BlockSpec((m, w), lambda g: (g, 0)),     # pred rows
            pl.BlockSpec((m, w), lambda g: (g, 0)),     # target rows
            pl.BlockSpec((m, 1), lambda g: (g, 0)),     # per-row wave-number scale
            pl.BlockSpec((m, m), lambda g: (0, 0)),     # row-pass band (resident)
            pl.BlockSpec((w, w), lambda g: (0, 0)),     # col-pass band (resident)
        ],
        out_specs=pl.BlockSpec((1, 1), lambda g: (0, 0)),
        scratch_shapes=[pltpu.VMEM((m, w), jnp.float32)],   # block-shaped accumulator
        compiler_params=pltpu.CompilerParams(
            dimension_semantics=("arbitrary",),
            vmem_limit_bytes=32 * 1024 * 1024,
        ),
    )(pred2, targ2, scale_col, a_big, b_col)
    return out[0, 0]


# --------------------------- pure numpy reference -----------------------------
def _ref_loss(pred, target):
    pred = np.asarray(pred, np.float64)
    target = np.asarray(target, np.float64)
    b, c, h, w = pred.shape
    K = np.tile(_KERNEL_1D, _N_K).reshape(_N_K, _N_K)   # every row == kernel_6

    def op(x2d):
        xp1 = np.pad(x2d, _CONV_PAD)
        out = np.zeros((h - 4, w - 4))
        for i in range(h - 4):
            for j in range(w - 4):
                out[i, j] = np.sum(K * xp1[i:i + _N_K, j:j + _N_K])
        return np.pad(out, _PAD)

    loss = 0.0
    for ch in range(c):
        wn = _WN_REAL if ch % 2 == 0 else _WN_IMAG
        se = 0.0
        for bb in range(b):
            px, tx = op(pred[bb, ch]), op(target[bb, ch])
            hp = 2.0 * px + _DX ** 2 * wn * pred[bb, ch]
            ht = 2.0 * tx + _DX ** 2 * wn * target[bb, ch]
            se += np.sum((hp - ht) ** 2)
        loss += (1.0 / c) * se / (b * h * w)
    return loss


if __name__ == "__main__":
    key = jax.random.PRNGKey(0)
    k1, k2 = jax.random.split(key)
    B, C, H, W = 2, 4, 16, 16
    pred = jax.random.normal(k1, (B, C, H, W), dtype=jnp.float32)
    target = jax.random.normal(k2, (B, C, H, W), dtype=jnp.float32)

    loss = helmholtz_loss(pred, target)
    jax.block_until_ready(loss)

    ref = _ref_loss(np.asarray(pred), np.asarray(target))
    np.testing.assert_allclose(float(loss), ref, rtol=2e-3, atol=1e-4)
    print("KERNEL_OK")
</pallas_src>

<mosaic_0001>
module attributes {stable_mosaic.version = 11 : i64} {
  func.func @_helmholtz_loss_kernel(%arg0: i32, %arg1: memref<128x16xf32, #tpu.memory_space<vmem>>, %arg2: memref<128x16xf32, #tpu.memory_space<vmem>>, %arg3: memref<128x1xf32, #tpu.memory_space<vmem>>, %arg4: memref<128x128xf32, #tpu.memory_space<vmem>>, %arg5: memref<16x16xf32, #tpu.memory_space<vmem>>, %arg6: memref<1x1xf32, #tpu.memory_space<vmem>>, %arg7: memref<128x16xf32, #tpu.memory_space<vmem>>) attributes {dimension_semantics = [#tpu.dimension_semantics<arbitrary>], iteration_bounds = array<i64: 1>, scalar_prefetch = 0 : i64, scratch_operands = 1 : i64, tpu.core_type = #tpu.core_type<tc>, window_params = [{transform_indices = @transform_0, window_bounds = array<i64: 128, 16>}, {transform_indices = @transform_1, window_bounds = array<i64: 128, 16>}, {transform_indices = @transform_2, window_bounds = array<i64: 128, 1>}, {pipeline_mode = #tpu.pipeline_mode<synchronous>, transform_indices = @transform_3, window_bounds = array<i64: 128, 128>}, {pipeline_mode = #tpu.pipeline_mode<synchronous>, transform_indices = @transform_4, window_bounds = array<i64: 16, 16>}, {pipeline_mode = #tpu.pipeline_mode<synchronous>, transform_indices = @transform_5, window_bounds = array<i64: 1, 1>}]} {
    %c0_i32 = arith.constant 0 : i32
    %0 = arith.cmpi eq, %arg0, %c0_i32 : i32
    %1 = arith.extui %0 : i1 to i32
    %c0_i32_0 = arith.constant 0 : i32
    %2 = arith.cmpi ne, %1, %c0_i32_0 : i32
    scf.if %2 {
      %cst_17 = arith.constant 0.000000e+00 : f32
      %21 = vector.broadcast %cst_17 : f32 to vector<128x16xf32>
      %c0_18 = arith.constant 0 : index
      %c0_19 = arith.constant 0 : index
      %22 = vector.load %arg7[%c0_18, %c0_19] : memref<128x16xf32, #tpu.memory_space<vmem>>, vector<128x16xf32>
      tpu.vector_store %arg7[%c0_18, %c0_19], %21 {strides = array<i32>} : memref<128x16xf32, #tpu.memory_space<vmem>>, vector<128x16xf32>,
      %cst_20 = arith.constant 0.000000e+00 : f32
      %23 = vector.broadcast %cst_20 : f32 to vector<1x1xf32>
      %c0_21 = arith.constant 0 : index
      %c0_22 = arith.constant 0 : index
      %24 = vector.load %arg6[%c0_21, %c0_22] : memref<1x1xf32, #tpu.memory_space<vmem>>, vector<1x1xf32>
      tpu.vector_store %arg6[%c0_21, %c0_22], %23 {strides = array<i32>} : memref<1x1xf32, #tpu.memory_space<vmem>>, vector<1x1xf32>,
    } else {
    }
    %c0 = arith.constant 0 : index
    %c0_1 = arith.constant 0 : index
    %3 = vector.load %arg1[%c0, %c0_1] : memref<128x16xf32, #tpu.memory_space<vmem>>, vector<128x16xf32>
    %c0_2 = arith.constant 0 : index
    %c0_3 = arith.constant 0 : index
    %4 = vector.load %arg2[%c0_2, %c0_3] : memref<128x16xf32, #tpu.memory_space<vmem>>, vector<128x16xf32>
    %5 = arith.subf %3, %4 : vector<128x16xf32>
    %c0_4 = arith.constant 0 : index
    %c0_5 = arith.constant 0 : index
    %6 = vector.load %arg4[%c0_4, %c0_5] : memref<128x128xf32, #tpu.memory_space<vmem>>, vector<128x128xf32>
    %cst = arith.constant dense<0.000000e+00> : vector<128x16xf32>
    %7 = tpu.matmul %6, %5, %cst {dimension_numbers = #tpu.dot_dimension_numbers<[1], [0], [0], [1], [0, 0, 1, 1], [], []>} : vector<128x128xf32>, vector<128x16xf32>, vector<128x16xf32> -> vector<128x16xf32>
    %c0_6 = arith.constant 0 : index
    %c0_7 = arith.constant 0 : index
    %8 = vector.load %arg5[%c0_6, %c0_7] : memref<16x16xf32, #tpu.memory_space<vmem>>, vector<16x16xf32>
    %cst_8 = arith.constant dense<0.000000e+00> : vector<128x16xf32>
    %9 = tpu.matmul %7, %8, %cst_8 {dimension_numbers = #tpu.dot_dimension_numbers<[1], [0], [0], [1], [0, 0, 1, 1], [], []>} : vector<128x16xf32>, vector<16x16xf32>, vector<128x16xf32> -> vector<128x16xf32>
    %c0_9 = arith.constant 0 : index
    %c0_10 = arith.constant 0 : index
    %10 = vector.load %arg3[%c0_9, %c0_10] : memref<128x1xf32, #tpu.memory_space<vmem>>, vector<128x1xf32>
    %11 = vector.broadcast %10 : vector<128x1xf32> to vector<128x16xf32>
    %12 = arith.mulf %11, %5 : vector<128x16xf32>
    %13 = arith.addf %9, %12 : vector<128x16xf32>
    %c0_11 = arith.constant 0 : index
    %c0_12 = arith.constant 0 : index
    %14 = vector.load %arg7[%c0_11, %c0_12] : memref<128x16xf32, #tpu.memory_space<vmem>>, vector<128x16xf32>
    %15 = arith.mulf %13, %13 : vector<128x16xf32>
    %16 = arith.addf %14, %15 : vector<128x16xf32>
    %c0_13 = arith.constant 0 : index
    %c0_14 = arith.constant 0 : index
    %17 = vector.load %arg7[%c0_13, %c0_14] : memref<128x16xf32, #tpu.memory_space<vmem>>, vector<128x16xf32>
    tpu.vector_store %arg7[%c0_13, %c0_14], %16 {strides = array<i32>} : memref<128x16xf32, #tpu.memory_space<vmem>>, vector<128x16xf32>,
    %c0_i32_15 = arith.constant 0 : i32
    %18 = arith.cmpi eq, %arg0, %c0_i32_15 : i32
    %19 = arith.extui %18 : i1 to i32
    %c0_i32_16 = arith.constant 0 : i32
    %20 = arith.cmpi ne, %19, %c0_i32_16 : i32
    scf.if %20 {
      %c0_17 = arith.constant 0 : index
      %c0_18 = arith.constant 0 : index
      %21 = vector.load %arg7[%c0_17, %c0_18] : memref<128x16xf32, #tpu.memory_space<vmem>>, vector<128x16xf32>
      %22 = vector.shape_cast %21 : vector<128x16xf32> to vector<1x128x16xf32>
      %cst_19 = arith.constant dense<0.000000e+00> : vector<1xf32>
      %23 = vector.multi_reduction <add>, %22, %cst_19 [1, 2] : vector<1x128x16xf32> to vector<1xf32>
      %24 = vector.shape_cast %23 : vector<1xf32> to vector<1x1x1xf32>
      %25 = vector.extract %24[0, 0, 0] : f32 from vector<1x1x1xf32>
      %cst_20 = arith.constant 4.8828125E-4 : f32
      %26 = arith.mulf %25, %cst_20 : f32
      %27 = vector.broadcast %26 : f32 to vector<1x1xf32>
      %c0_21 = arith.constant 0 : index
      %c0_22 = arith.constant 0 : index
      %28 = vector.load %arg6[%c0_21, %c0_22] : memref<1x1xf32, #tpu.memory_space<vmem>>, vector<1x1xf32>
      tpu.vector_store %arg6[%c0_21, %c0_22], %27 {strides = array<i32>} : memref<1x1xf32, #tpu.memory_space<vmem>>, vector<1x1xf32>,
    } else {
    }
    return
  }
  func.func @transform_0(%arg0: i32) -> (i32, i32) {
    %c0_i32 = arith.constant 0 : i32
    %c0_i32_0 = arith.constant 0 : i32
    return %arg0, %c0_i32 : i32, i32
  }
  func.func @transform_1(%arg0: i32) -> (i32, i32) {
    %c0_i32 = arith.constant 0 : i32
    %c0_i32_0 = arith.constant 0 : i32
    return %arg0, %c0_i32 : i32, i32
  }
  func.func @transform_2(%arg0: i32) -> (i32, i32) {
    %c0_i32 = arith.constant 0 : i32
    %c0_i32_0 = arith.constant 0 : i32
    return %arg0, %c0_i32 : i32, i32
  }
  func.func @transform_3(%arg0: i32) -> (i32, i32) {
    %c0_i32 = arith.constant 0 : i32
    %c0_i32_0 = arith.constant 0 : i32
    %c0_i32_1 = arith.constant 0 : i32
    return %c0_i32, %c0_i32_0 : i32, i32
  }
  func.func @transform_4(%arg0: i32) -> (i32, i32) {
    %c0_i32 = arith.constant 0 : i32
    %c0_i32_0 = arith.constant 0 : i32
    %c0_i32_1 = arith.constant 0 : i32
    return %c0_i32, %c0_i32_0 : i32, i32
  }
  func.func @transform_5(%arg0: i32) -> (i32, i32) {
    %c0_i32 = arith.constant 0 : i32
    %c0_i32_0 = arith.constant 0 : i32
    %c0_i32_1 = arith.constant 0 : i32
    return %c0_i32, %c0_i32_0 : i32, i32
  }
}

</mosaic_0001>

<bundles_post_ra>
// kernel: tpu_custom_call.1
= control target key start
LH: loop header
LB: loop body
LE: loop exit
PB: predicated region body
PF: predicated region fallthrough
CT: control target
= control target key end

     0   :  { %s1309_s0 = inlined_call_operand.vmem [shape: f32[128,16], index: 0, kind: input, shape index: {}]   ;;  %s1310_s1 = inlined_call_operand.vmem [shape: f32[128,16], index: 1, kind: input, shape index: {}]   ;;  %s1311_s2 = inlined_call_operand.vmem [shape: f32[128,1], index: 2, kind: input, shape index: {}]   ;;  %s1312_s3 = inlined_call_operand.vmem [shape: f32[128,128], index: 3, kind: input, shape index: {}]   ;;  %s1313_s4 = inlined_call_operand.vmem [shape: f32[16,16], index: 4, kind: input, shape index: {}]   ;;  %s1314_s5 = inlined_call_operand.hbm [shape: f32[1,1], index: 5, kind: output, shape index: {}]  }
   0x1   :  { %v44_v0 = vld [vmem:[%s1309_s0] sm:$0xff]  ;;  %v45_v1 = vld [vmem:[%s1309_s0 + $0x8] sm:$0xff]  ;;  %v46_v5 = vld [vmem:[%s1309_s0 + $0x10] sm:$0xff] }
   0x2   :  { %v60_v2 = vld [vmem:[%s1310_s1] sm:$0xff]  ;;  %v61_v3 = vld [vmem:[%s1310_s1 + $0x8] sm:$0xff]  ;;  %v47_v6 = vld [vmem:[%s1309_s0 + $0x18] sm:$0xff] }
   0x3   :  { %v964_v4 = vsub.f32 %v44_v0, %v60_v2  ;;  %v972_v7 = vsub.f32 %v45_v1, %v61_v3  ;;  %v62_v8 = vld [vmem:[%s1310_s1 + $0x10] sm:$0xff]  ;;  %v63_v9 = vld [vmem:[%s1310_s1 + $0x18] sm:$0xff]  ;;  %v48_v10 = vld [vmem:[%s1309_s0 + $0x20] sm:$0xff] }
   0x4   :  { %v983_v11 = vsub.f32 %v46_v5, %v62_v8  ;;  %v985_v12 = vsub.f32 %v47_v6, %v63_v9  ;;  %v49_v13 = vld [vmem:[%s1309_s0 + $0x28] sm:$0xff]  ;;  %v64_v14 = vld [vmem:[%s1310_s1 + $0x20] sm:$0xff]  ;;  %v50_v19 = vld [vmem:[%s1309_s0 + $0x30] sm:$0xff] }
   0x5   :  { %v65_v15 = vld [vmem:[%s1310_s1 + $0x28] sm:$0xff]  ;;  %v852_v16 = vpack.c.bf16 %v972_v7, %v964_v4  ;;  %v998_v17 = vsub.f32 %v48_v10, %v64_v14  ;;  %v51_v21 = vld [vmem:[%s1309_s0 + $0x38] sm:$0xff]  ;;  %v66_v22 = vld [vmem:[%s1310_s1 + $0x30] sm:$0xff] }
   0x6   :  { %v1000_v18 = vsub.f32 %v49_v13, %v65_v15  ;;  %v856_v20 = vpack.c.bf16 %v985_v12, %v983_v11  ;;  %v67_v23 = vld [vmem:[%s1310_s1 + $0x38] sm:$0xff]  ;;  %v1018_v25 = vsub.f32 %v50_v19, %v66_v22  ;;  %v52_v27 = vld [vmem:[%s1309_s0 + $0x40] sm:$0xff]  ;;  %v53_v28 = vld [vmem:[%s1309_s0 + $0x48] sm:$0xff] }
   0x7   :  { %853 = vmatprep.subr.bf16.mxu0 %v852_v16  ;;  %v1020_v26 = vsub.f32 %v51_v21, %v67_v23  ;;  %v68_v29 = vld [vmem:[%s1310_s1 + $0x40] sm:$0xff]  ;;  %v69_v30 = vld [vmem:[%s1310_s1 + $0x48] sm:$0xff]  ;;  %v54_v35 = vld [vmem:[%s1309_s0 + $0x50] sm:$0xff] }
   0x8   :  { %855 = vmatpush3.bf16.msra.mxu0 %v852_v16  ;;  %v860_v24 = vpack.c.bf16 %v1000_v18, %v998_v17  ;;  %v92_v31 = vld [vmem:[%s1312_s3] sm:$0xff]  ;;  %v1039_v33 = vsub.f32 %v52_v27, %v68_v29  ;;  %v1041_v34 = vsub.f32 %v53_v28, %v69_v30  ;;  %v55_v36 = vld [vmem:[%s1309_s0 + $0x58] sm:$0xff]  ;;  %v70_v37 = vld [vmem:[%s1310_s1 + $0x50] sm:$0xff] }
   0x9   :  { %857 = vmatprep.subr.bf16.mxu0 %v856_v20  ;;  %800 = vmatprep.mubr.f32.mxu0 %v92_v31  ;;  %v864_v32 = vpack.c.bf16 %v1020_v26, %v1018_v25  ;;  %v71_v38 = vld [vmem:[%s1310_s1 + $0x58] sm:$0xff]  ;;  %v56_v39 = vld [vmem:[%s1309_s0 + $0x60] sm:$0xff]  ;;  %v1060_v41 = vsub.f32 %v54_v35, %v70_v37  ;;  %v254_v44 = vld [vmem:[%s1313_s4 + $0x8] sm:$0xff] }
   0xa   :  { %v868_v40 = vpack.c.bf16 %v1041_v34, %v1039_v33  ;;  %v1062_v42 = vsub.f32 %v55_v36, %v71_v38  ;;  %v253_v43 = vld [vmem:[%s1313_s4] sm:$0xff] }
   0xc   :  { %859 = vmatpush3.bf16.msra.mxu0 %v856_v20 }
   0xd   :  { %861 = vmatprep.subr.bf16.mxu0 %v860_v24 }
  0x10   :  { %863 = vmatpush3.bf16.msra.mxu0 %v860_v24 }
  0x11   :  { %865 = vmatprep.subr.bf16.mxu0 %v864_v32 }
  0x12   :  { %10 = vsyncpa [#allocation4], 0  ;;  %v57_v45 = vld [vmem:[%s1309_s0 + $0x68] sm:$0xff]  ;;  %v72_v46 = vld [vmem:[%s1310_s1 + $0x60] sm:$0xff]  ;;  %v884_v48 = vpack.c.bf16 %v254_v44, %v253_v43  ;;  %v872_v49 = vpack.c.bf16 %v1062_v42, %v1060_v41  ;;  %v919_v19 = vmov 0   ;;  %vm25_vm0 = vcmask 130048  }
  0x13   :  { %v73_v47 = vld [vmem:[%s1310_s1 + $0x68] sm:$0xff]  ;;  %v1081_v50 = vsub.f32 %v56_v39, %v72_v46  ;;  %v58_v52 = vld [vmem:[%s1309_s0 + $0x70] sm:$0xff]  ;;  %v59_v53 = vld [vmem:[%s1309_s0 + $0x78] sm:$0xff]  ;;  %893 = vset.pattern.permute.xlu0 %v919_v19  ;;  %894 = vset.pattern.permute.xlu1 %v919_v19  ;;  %v920_v38 = vmov 0.0   ;;  %vm42_vm1 = vcmask 0  }
  0x14   :  { %867 = vmatpush3.bf16.msra.mxu0 %v864_v32  ;;  %885 = vmatprep.subr.bf16.mxu1 %v884_v48  ;;  %v1083_v51 = vsub.f32 %v57_v45, %v73_v47  ;;  %v74_v54 = vld [vmem:[%s1310_s1 + $0x70] sm:$0xff]  ;;  %v75_v55 = vld [vmem:[%s1310_s1 + $0x78] sm:$0xff]  ;;  %v93_v60 = vld [vmem:[%s1312_s3 + $0x8] sm:$0xff]  ;;  %27 = vst.msk [vmem:[#allocation2 + $0x8] sm:$0xff] %vm25_vm0, %v920_v38 }
  0x15   :  { %869 = vmatprep.subr.bf16.mxu0 %v868_v40  ;;  %887 = vmatpush3.bf16.msra.mxu1 %v884_v48  ;;  %v1099_v57 = vsub.f32 %v58_v52, %v74_v54  ;;  %v1101_v58 = vsub.f32 %v59_v53, %v75_v55  ;;  %v94_v61 = vld [vmem:[%s1312_s3 + $0x10] sm:$0xff]  ;;  %v95_v62 = vld [vmem:[%s1312_s3 + $0x18] sm:$0xff]  ;;  %v96_v63 = vld [vmem:[%s1312_s3 + $0x20] sm:$0xff]  ;;  %26 = vst.msk [vmem:[#allocation2] sm:$0xff] %vm25_vm0, %v920_v38 }
  0x16   :  { %v876_v56 = vpack.c.bf16 %v1083_v51, %v1081_v50  ;;  %v97_v0 = vld [vmem:[%s1312_s3 + $0x28] sm:$0xff]  ;;  %v98_v1 = vld [vmem:[%s1312_s3 + $0x30] sm:$0xff]  ;;  %v99_v2 = vld [vmem:[%s1312_s3 + $0x38] sm:$0xff]  ;;  %28 = vst.msk [vmem:[#allocation2 + $0x10] sm:$0xff] %vm25_vm0, %v920_v38 }
  0x17   :  { %v880_v59 = vpack.c.bf16 %v1101_v58, %v1099_v57  ;;  %v100_v3 = vld [vmem:[%s1312_s3 + $0x40] sm:$0xff]  ;;  %v101_v5 = vld [vmem:[%s1312_s3 + $0x48] sm:$0xff]  ;;  %v102_v6 = vld [vmem:[%s1312_s3 + $0x50] sm:$0xff]  ;;  %29 = vst.msk [vmem:[#allocation2 + $0x18] sm:$0xff] %vm25_vm0, %v920_v38 }
  0x18   :  { %871 = vmatpush3.bf16.msra.mxu0 %v868_v40  ;;  %v103_v8 = vld [vmem:[%s1312_s3 + $0x58] sm:$0xff]  ;;  %v104_v9 = vld [vmem:[%s1312_s3 + $0x60] sm:$0xff]  ;;  %v105_v10 = vld [vmem:[%s1312_s3 + $0x68] sm:$0xff]  ;;  %30 = vst.msk [vmem:[#allocation2 + $0x20] sm:$0xff] %vm25_vm0, %v920_v38 }
  0x19   :  { %873 = vmatprep.subr.bf16.mxu0 %v872_v49  ;;  %v106_v13 = vld [vmem:[%s1312_s3 + $0x70] sm:$0xff]  ;;  %v107_v14 = vld [vmem:[%s1312_s3 + $0x78] sm:$0xff]  ;;  %v255_v15 = vld [vmem:[%s1311_s2] sm:$0xff]  ;;  %31 = vst.msk [vmem:[#allocation2 + $0x28] sm:$0xff] %vm25_vm0, %v920_v38 }
  0x1a   :  { %v257_v16 = vld [vmem:[%s1311_s2 + $0x10] sm:$0xff]  ;;  %273 = vperm.xlu0 %893, %v255_v15   ;;  %v256_v20 = vld [vmem:[%s1311_s2 + $0x8] sm:$0xff]  ;;  %v258_v21 = vld [vmem:[%s1311_s2 + $0x18] sm:$0xff]  ;;  %32 = vst.msk [vmem:[#allocation2 + $0x30] sm:$0xff] %vm25_vm0, %v920_v38 }
  0x1b   :  { %283 = vperm.xlu1 %894, %v257_v16   ;;  %v259_v22 = vld [vmem:[%s1311_s2 + $0x20] sm:$0xff]  ;;  %v260_v23 = vld [vmem:[%s1311_s2 + $0x28] sm:$0xff]  ;;  %v261_v24 = vld [vmem:[%s1311_s2 + $0x30] sm:$0xff]  ;;  %33 = vst.msk [vmem:[#allocation2 + $0x38] sm:$0xff] %vm25_vm0, %v920_v38 }
  0x1c   :  { %875 = vmatpush3.bf16.msra.mxu0 %v872_v49  ;;  %v262_v27 = vld [vmem:[%s1311_s2 + $0x38] sm:$0xff]  ;;  %v263_v28 = vld [vmem:[%s1311_s2 + $0x40] sm:$0xff]  ;;  %v264_v29 = vld [vmem:[%s1311_s2 + $0x48] sm:$0xff]  ;;  %34 = vst.msk [vmem:[#allocation2 + $0x40] sm:$0xff] %vm25_vm0, %v920_v38 }
  0x1d   :  { %877 = vmatprep.subr.bf16.mxu0 %v876_v56  ;;  %v265_v30 = vld [vmem:[%s1311_s2 + $0x50] sm:$0xff]  ;;  %v266_v31 = vld [vmem:[%s1311_s2 + $0x58] sm:$0xff]  ;;  %v267_v32 = vld [vmem:[%s1311_s2 + $0x60] sm:$0xff]  ;;  %35 = vst.msk [vmem:[#allocation2 + $0x48] sm:$0xff] %vm25_vm0, %v920_v38 }
  0x1e   :  { %278 = vperm.xlu0 %893, %v256_v20   ;;  %v268_v35 = vld [vmem:[%s1311_s2 + $0x68] sm:$0xff]  ;;  %v269_v36 = vld [vmem:[%s1311_s2 + $0x70] sm:$0xff]  ;;  %v270_v37 = vld [vmem:[%s1311_s2 + $0x78] sm:$0xff]  ;;  %36 = vst.msk [vmem:[#allocation2 + $0x50] sm:$0xff] %vm25_vm0, %v920_v38  ;;  %s921_s2 = smov [#allocation3]  }
  0x1f   :  { %288 = vperm.xlu1 %894, %v258_v21   ;;  %37 = vst.msk [vmem:[#allocation2 + $0x58] sm:$0xff] %vm25_vm0, %v920_v38  ;;  %38 = vst.msk [vmem:[#allocation2 + $0x60] sm:$0xff] %vm25_vm0, %v920_v38  ;;  %v562_v15 = vld [vmem:[#allocation2 + $0x8] sm:$0xff]  ;;  %v561_v20 = vld [vmem:[#allocation2] sm:$0xff]  ;;  %s694_s15 = sshll.u32 %s921_s2, 4  ;;  %s695_s15 = int_to_ptr.vmem [resolvable:$true] %s694_s15 }
  0x20   :  { %879 = vmatpush3.bf16.msra.mxu0 %v876_v56  ;;  %39 = vst.msk [vmem:[#allocation2 + $0x68] sm:$0xff] %vm25_vm0, %v920_v38  ;;  %40 = vst.msk [vmem:[#allocation2 + $0x70] sm:$0xff] %vm25_vm0, %v920_v38  ;;  %s895_s18 = scalar_lea.vmem %s695_s15, 16  ;;  %s899_s3 = scalar_lea.vmem %s695_s15, 32 }
  0x21   :  { %881 = vmatprep.subr.bf16.mxu0 %v880_v59  ;;  %41 = vst.msk [vmem:[#allocation2 + $0x78] sm:$0xff] %vm25_vm0, %v920_v38  ;;  %p896_p0 = scmp.ne.s32.totalorder %s695_s15, %s895_s18  ;;  %p900_p1 = scmp.lt.s32.totalorder %s695_s15, %s695_s15 }
  0x22   :  { %293 = vperm.xlu0 %893, %v259_v22   ;;  %43 = vst.msk [vmem:[#allocation3] sm:$0x1] %vm42_vm1, %v920_v38  ;;  %p901_p2 = scmp.lt.s32.totalorder %s899_s3, %s895_s18 }
  0x23   :  { %298 = vperm.xlu1 %894, %v260_v23  }
  0x24   :  { %883 = vmatpush3.bf16.msra.mxu0 %v880_v59  ;;  %p902_p3 = por %p901_p2, %p900_p1 }
  0x26   :  { %303 = vperm.xlu0 %893, %v261_v24   ;;  %p903_p4 = pnand %p902_p3, %p896_p0 }
  0x27   :  { %801 = vmatmul.mubr.f32.vlgmr.msra.gmra.mrb[0].mxu0 %v93_v60  ;;  %308 = vperm.xlu1 %894, %v262_v27  }
  0x28   :  { %803 = vmatprep.mubr.f32.mxu0 %v94_v61 }
  0x2a   :  { %313 = vperm.xlu0 %893, %v263_v28  }
  0x2b   :  { %804 = vmatmul.mubr.f32.gmra.mrb[2].mxu0 %v95_v62  ;;  %318 = vperm.xlu1 %894, %v264_v29   ;;  %v564_v29 = vld [vmem:[#allocation2 + $0x18] sm:$0xff] }
  0x2c   :  { %806 = vmatprep.mubr.f32.mxu0 %v96_v63 }
  0x2e   :  { %323 = vperm.xlu0 %893, %v265_v30  }
  0x2f   :  { %807 = vmatmul.mubr.f32.gmra.mrb[4].mxu0 %v97_v0  ;;  %328 = vperm.xlu1 %894, %v266_v31  }
  0x30   :  { %809 = vmatprep.mubr.f32.mxu0 %v98_v1 }
  0x32   :  { %333 = vperm.xlu0 %893, %v267_v32  }
  0x33   :  { %810 = vmatmul.mubr.f32.gmra.mrb[6].mxu0 %v99_v2  ;;  %338 = vperm.xlu1 %894, %v268_v35   ;;  %v563_v35 = vld [vmem:[#allocation2 + $0x10] sm:$0xff] }
  0x34   :  { %812 = vmatprep.mubr.f32.mxu0 %v100_v3 }
  0x36   :  { %343 = vperm.xlu0 %893, %v269_v36  }
  0x37   :  { %813 = vmatmul.mubr.f32.gmra.mrb[8].mxu0 %v101_v5  ;;  %348 = vperm.xlu1 %894, %v270_v37  }
  0x38   :  { %815 = vmatprep.mubr.f32.mxu0 %v102_v6 }
  0x3b   :  { %816 = vmatmul.mubr.f32.gmra.mrb[10].mxu0 %v103_v8 }
  0x3c   :  { %818 = vmatprep.mubr.f32.mxu0 %v104_v9 }
  0x3f   :  { %819 = vmatmul.mubr.f32.gmra.mrb[12].mxu0 %v105_v10 }
  0x40   :  { %821 = vmatprep.mubr.f32.mxu0 %v106_v13 }
  0x43   :  { %822 = vmatmul.mubr.f32.gmra.mrb[14].mxu0 %v107_v14 }
  0x99   :  { %v274_v62 = vpop.permute.xlu0 %273 }
  0x9a   :  { %v284_v61 = vpop.permute.xlu1 %283  ;;  %v351_v5 = vmul.f32 %v274_v62, %v964_v4 }
  0x9b   :  { %v353_v21 = vmul.f32 %v284_v61, %v983_v11  ;;  %v568_v61 = vld [vmem:[#allocation2 + $0x38] sm:$0xff] }
  0x9d   :  { %v279_v0 = vpop.permute.xlu0 %278 }
  0x9e   :  { %v289_v63 = vpop.permute.xlu1 %288  ;;  %v352_v3 = vmul.f32 %v279_v0, %v972_v7 }
  0x9f   :  { %v354_v9 = vmul.f32 %v289_v63, %v985_v12 }
  0xa1   :  { %v294_v2 = vpop.permute.xlu0 %293 }
  0xa2   :  { %v299_v1 = vpop.permute.xlu1 %298  ;;  %v355_v36 = vmul.f32 %v294_v2, %v998_v17 }
  0xa3   :  { %v356_v12 = vmul.f32 %v299_v1, %v1000_v18  ;;  %v567_v1 = vld [vmem:[#allocation2 + $0x30] sm:$0xff] }
  0xa5   :  { %v304_v10 = vpop.permute.xlu0 %303 }
  0xa6   :  { %v309_v6 = vpop.permute.xlu1 %308 }
  0xa9   :  { %v314_v31 = vpop.permute.xlu0 %313 }
  0xaa   :  { %v319_v28 = vpop.permute.xlu1 %318  ;;  %v359_v2 = vmul.f32 %v314_v31, %v1039_v33 }
  0xfa   :  { %v802_v39 = vpop.f32.mrb[0].mxu0 }
  0xfb   :  { %v174_v40 = vpop.f32.mrb[1].mxu0 }
  0xfc   :  { %828 = vmatprep.mubr.msk.f32.mxu1 %vm25_vm0, %v174_v40 }
  0xfd   :  { %829 = vmatmul.mubr.msk.f32.vlgmr.msra.gmra.mrb[0].mxu1 %vm25_vm0, %v802_v39 }
  0xfe   :  { %v805_v43 = vpop.f32.mrb[2].mxu0 }
  0xff   :  { %v184_v44 = vpop.f32.mrb[3].mxu0 }
 0x100   :  { %831 = vmatprep.mubr.msk.f32.mxu1 %vm25_vm0, %v184_v44 }
 0x101   :  { %832 = vmatmul.mubr.msk.f32.gmra.mrb[2].mxu1 %vm25_vm0, %v805_v43 }
 0x102   :  { %v808_v45 = vpop.f32.mrb[4].mxu0 }
 0x103   :  { %v194_v46 = vpop.f32.mrb[5].mxu0 }
 0x104   :  { %834 = vmatprep.mubr.msk.f32.mxu1 %vm25_vm0, %v194_v46 }
 0x105   :  { %835 = vmatmul.mubr.msk.f32.gmra.mrb[4].mxu1 %vm25_vm0, %v808_v45  ;;  %v566_v45 = vld [vmem:[#allocation2 + $0x28] sm:$0xff] }
 0x106   :  { %v811_v47 = vpop.f32.mrb[6].mxu0 }
 0x107   :  { %v204_v48 = vpop.f32.mrb[7].mxu0 }
 0x108   :  { %837 = vmatprep.mubr.msk.f32.mxu1 %vm25_vm0, %v204_v48  ;;  %v565_v48 = vld [vmem:[#allocation2 + $0x20] sm:$0xff] }
 0x109   :  { %838 = vmatmul.mubr.msk.f32.gmra.mrb[6].mxu1 %vm25_vm0, %v811_v47  ;;  %v358_v47 = vmul.f32 %v309_v6, %v1020_v26  ;;  %v360_v26 = vmul.f32 %v319_v28, %v1041_v34 }
 0x10a   :  { %v814_v49 = vpop.f32.mrb[8].mxu0 }
 0x10b   :  { %v214_v52 = vpop.f32.mrb[9].mxu0 }
 0x10c   :  { %840 = vmatprep.mubr.msk.f32.mxu1 %vm25_vm0, %v214_v52  ;;  %v329_v52 = vpop.permute.xlu1 %328 }
 0x10d   :  { %841 = vmatmul.mubr.msk.f32.gmra.mrb[8].mxu1 %vm25_vm0, %v814_v49  ;;  %v357_v49 = vmul.f32 %v304_v10, %v1018_v25 }
 0x10e   :  { %v817_v53 = vpop.f32.mrb[10].mxu0 }
 0x10f   :  { %v224_v54 = vpop.f32.mrb[11].mxu0 }
 0x110   :  { %843 = vmatprep.mubr.msk.f32.mxu1 %vm25_vm0, %v224_v54  ;;  %v324_v54 = vpop.permute.xlu0 %323 }
 0x111   :  { %844 = vmatmul.mubr.msk.f32.gmra.mrb[10].mxu1 %vm25_vm0, %v817_v53 }
 0x112   :  { %v820_v55 = vpop.f32.mrb[12].mxu0 }
 0x113   :  { %v234_v56 = vpop.f32.mrb[13].mxu0 }
 0x114   :  { %846 = vmatprep.mubr.msk.f32.mxu1 %vm25_vm0, %v234_v56 }
 0x115   :  { %847 = vmatmul.mubr.msk.f32.gmra.mrb[12].mxu1 %vm25_vm0, %v820_v55 }
 0x116   :  { %v823_v59 = vpop.f32.mrb[14].mxu0 }
 0x117   :  { %v244_v60 = vpop.f32.mrb[15].mxu0 }
 0x118   :  { %849 = vmatprep.mubr.msk.f32.mxu1 %vm25_vm0, %v244_v60 }
 0x119   :  { %850 = vmatmul.mubr.msk.f32.gmra.mrb[14].mxu1 %vm25_vm0, %v823_v59 }
 0x1d0   :  { %v830_v8 = vpop.f32.mrb[0].mxu1 }
 0x1d1   :  { %v488_v13 = vadd.f32 %v830_v8, %v352_v3  ;;  %v482_v14 = vpop.f32.mrb[1].mxu1 }
 0x1d2   :  { %v483_v16 = vadd.f32 %v482_v14, %v351_v5  ;;  %v339_v14 = vpop.permute.xlu1 %338 }
 0x1d3   :  { %v578_v19 = vmul.f32 %v488_v13, %v488_v13 }
 0x1d4   :  { %v577_v22 = vmul.f32 %v483_v16, %v483_v16  ;;  %v833_v23 = vpop.f32.mrb[2].mxu1 }
 0x1d5   :  { %v594_v24 = vadd.f32 %v578_v19, %v562_v15  ;;  %v498_v27 = vadd.f32 %v833_v23, %v354_v9  ;;  %v492_v7 = vpop.f32.mrb[3].mxu1  ;;  %v570_v15 = vld [vmem:[#allocation2 + $0x48] sm:$0xff]  ;;  %v362_v19 = vmul.f32 %v329_v52, %v1062_v42 }
 0x1d6   :  { %v593_v4 = vadd.f32 %v577_v22, %v561_v20  ;;  %v493_v30 = vadd.f32 %v492_v7, %v353_v21  ;;  %v334_v20 = vpop.permute.xlu0 %333  ;;  %v569_v21 = vld [vmem:[#allocation2 + $0x40] sm:$0xff] }
 0x1d7   :  { %610 = vst.msk [vmem:[#allocation2 + $0x8] sm:$0xff] %vm25_vm0, %v594_v24  ;;  %v580_v32 = vmul.f32 %v498_v27, %v498_v27  ;;  %v361_v27 = vmul.f32 %v324_v54, %v1060_v41  ;;  %v574_v54 = vld [vmem:[#allocation2 + $0x68] sm:$0xff] }
 0x1d8   :  { %609 = vst.msk [vmem:[#allocation2] sm:$0xff] %vm25_vm0, %v593_v4  ;;  %v579_v11 = vmul.f32 %v493_v30, %v493_v30  ;;  %v836_v37 = vpop.f32.mrb[4].mxu1 }
 0x1d9   :  { %v596_v39 = vadd.f32 %v580_v32, %v564_v29  ;;  %v508_v40 = vadd.f32 %v836_v37, %v356_v12  ;;  %v502_v43 = vpop.f32.mrb[5].mxu1  ;;  %v572_v32 = vld [vmem:[#allocation2 + $0x58] sm:$0xff]  ;;  %v571_v37 = vld [vmem:[#allocation2 + $0x50] sm:$0xff] }
 0x1da   :  { %v595_v44 = vadd.f32 %v579_v11, %v563_v35  ;;  %v503_v46 = vadd.f32 %v502_v43, %v355_v36  ;;  %v364_v11 = vmul.f32 %v339_v14, %v1083_v51  ;;  %v575_v14 = vld [vmem:[#allocation2 + $0x70] sm:$0xff] }
 0x1db   :  { %612 = vst.msk [vmem:[#allocation2 + $0x18] sm:$0xff] %vm25_vm0, %v596_v39  ;;  %v582_v18 = vmul.f32 %v508_v40, %v508_v40 }
 0x1dc   :  { %611 = vst.msk [vmem:[#allocation2 + $0x10] sm:$0xff] %vm25_vm0, %v595_v44  ;;  %v581_v17 = vmul.f32 %v503_v46, %v503_v46  ;;  %v839_v53 = vpop.f32.mrb[6].mxu1  ;;  %v363_v44 = vmul.f32 %v334_v20, %v1081_v50 }
 0x1dd   :  { %v598_v55 = vadd.f32 %v582_v18, %v566_v45  ;;  %v518_v56 = vadd.f32 %v839_v53, %v358_v47  ;;  %v512_v59 = vpop.f32.mrb[7].mxu1  ;;  %v349_v45 = vpop.permute.xlu1 %348 }
 0x1de   :  { %v597_v60 = vadd.f32 %v581_v17, %v565_v48  ;;  %v513_v62 = vadd.f32 %v512_v59, %v357_v49  ;;  %v629_v63 = vld [vmem:[#allocation2 + $0x8] sm:$0xff]  ;;  %v344_v48 = vpop.permute.xlu0 %343  ;;  %v366_v59 = vmul.f32 %v349_v45, %v1101_v58 }
 0x1df   :  { %614 = vst.msk [vmem:[#allocation2 + $0x28] sm:$0xff] %vm25_vm0, %v598_v55  ;;  %v584_v0 = vmul.f32 %v518_v56, %v518_v56  ;;  %v628_v25 = vld [vmem:[#allocation2] sm:$0xff]  ;;  %v645_v8 = vsel %vm25_vm0, %v629_v63, 0.0 }
 0x1e0   :  { %613 = vst.msk [vmem:[#allocation2 + $0x20] sm:$0xff] %vm25_vm0, %v597_v60  ;;  %v583_v3 = vmul.f32 %v513_v62, %v513_v62  ;;  %v842_v5 = vpop.f32.mrb[8].mxu1  ;;  %v644_v6 = vsel %vm25_vm0, %v628_v25, 0.0  ;;  %v573_v60 = vld [vmem:[#allocation2 + $0x60] sm:$0xff] }
 0x1e1   :  { %v600_v9 = vadd.f32 %v584_v0, %v568_v61  ;;  %v528_v10 = vadd.f32 %v842_v5, %v360_v26  ;;  %v522_v13 = vpop.f32.mrb[9].mxu1  ;;  %v646_v24 = vadd.f32 %v645_v8, %v644_v6  ;;  %v365_v26 = vmul.f32 %v344_v48, %v1099_v57  ;;  %v576_v8 = vld [vmem:[#allocation2 + $0x78] sm:$0xff] }
 0x1e2   :  { %v599_v34 = vadd.f32 %v583_v3, %v567_v1  ;;  %v523_v16 = vadd.f32 %v522_v13, %v359_v2  ;;  %v631_v23 = vld [vmem:[#allocation2 + $0x18] sm:$0xff] }
 0x1e3   :  { %616 = vst.msk [vmem:[#allocation2 + $0x38] sm:$0xff] %vm25_vm0, %v600_v9  ;;  %v586_v33 = vmul.f32 %v528_v10, %v528_v10  ;;  %v630_v22 = vld [vmem:[#allocation2 + $0x10] sm:$0xff]  ;;  %v649_v36 = vsel %vm25_vm0, %v631_v23, 0.0 }
 0x1e4   :  { %615 = vst.msk [vmem:[#allocation2 + $0x30] sm:$0xff] %vm25_vm0, %v599_v34  ;;  %v585_v7 = vmul.f32 %v523_v16, %v523_v16  ;;  %v845_v28 = vpop.f32.mrb[10].mxu1  ;;  %v647_v4 = vsel %vm25_vm0, %v630_v22, 0.0 }
 0x1e5   :  { %v602_v29 = vadd.f32 %v586_v33, %v570_v15  ;;  %v538_v30 = vadd.f32 %v845_v28, %v362_v19  ;;  %v532_v12 = vpop.f32.mrb[11].mxu1  ;;  %v648_v42 = vadd.f32 %v647_v4, %v646_v24 }
 0x1e6   :  { %v601_v31 = vadd.f32 %v585_v7, %v569_v21  ;;  %v533_v35 = vadd.f32 %v532_v12, %v361_v27  ;;  %v633_v40 = vld [vmem:[#allocation2 + $0x28] sm:$0xff] }
 0x1e7   :  { %618 = vst.msk [vmem:[#allocation2 + $0x48] sm:$0xff] %vm25_vm0, %v602_v29  ;;  %v588_v41 = vmul.f32 %v538_v30, %v538_v30  ;;  %v632_v39 = vld [vmem:[#allocation2 + $0x20] sm:$0xff]  ;;  %v650_v43 = vadd.f32 %v649_v36, %v648_v42  ;;  %v653_v56 = vsel %vm25_vm0, %v633_v40, 0.0 }
 0x1e8   :  { %617 = vst.msk [vmem:[#allocation2 + $0x40] sm:$0xff] %vm25_vm0, %v601_v31  ;;  %v587_v46 = vmul.f32 %v533_v35, %v533_v35  ;;  %v848_v47 = vpop.f32.mrb[12].mxu1  ;;  %v651_v18 = vsel %vm25_vm0, %v632_v39, 0.0 }
 0x1e9   :  { %v604_v49 = vadd.f32 %v588_v41, %v572_v32  ;;  %v548_v52 = vadd.f32 %v848_v47, %v364_v11  ;;  %v542_v51 = vpop.f32.mrb[13].mxu1  ;;  %v652_v17 = vadd.f32 %v651_v18, %v650_v43 }
 0x1ea   :  { %v603_v53 = vadd.f32 %v587_v46, %v571_v37  ;;  %v543_v55 = vadd.f32 %v542_v51, %v363_v44  ;;  %v635_v62 = vld [vmem:[#allocation2 + $0x38] sm:$0xff] }
 0x1eb   :  { %620 = vst.msk [vmem:[#allocation2 + $0x58] sm:$0xff] %vm25_vm0, %v604_v49  ;;  %v590_v50 = vmul.f32 %v548_v52, %v548_v52  ;;  %v634_v61 = vld [vmem:[#allocation2 + $0x30] sm:$0xff]  ;;  %v654_v63 = vadd.f32 %v653_v56, %v652_v17  ;;  %v657_v10 = vsel %vm25_vm0, %v635_v62, 0.0 }
 0x1ec   :  { %619 = vst.msk [vmem:[#allocation2 + $0x50] sm:$0xff] %vm25_vm0, %v603_v53  ;;  %v589_v0 = vmul.f32 %v543_v55, %v543_v55  ;;  %v851_v1 = vpop.f32.mrb[14].mxu1  ;;  %v655_v25 = vsel %vm25_vm0, %v634_v61, 0.0 }
 0x1ed   :  { %v606_v2 = vadd.f32 %v590_v50, %v574_v54  ;;  %v558_v3 = vadd.f32 %v851_v1, %v366_v59  ;;  %v552_v5 = vpop.f32.mrb[15].mxu1  ;;  %v656_v6 = vadd.f32 %v655_v25, %v654_v63 }
 0x1ee   :  { %v605_v58 = vadd.f32 %v589_v0, %v573_v60  ;;  %v553_v9 = vadd.f32 %v552_v5, %v365_v26  ;;  %v637_v34 = vld [vmem:[#allocation2 + $0x48] sm:$0xff] }
 0x1ef   :  { %622 = vst.msk [vmem:[#allocation2 + $0x68] sm:$0xff] %vm25_vm0, %v606_v2  ;;  %v592_v13 = vmul.f32 %v558_v3, %v558_v3  ;;  %v636_v57 = vld [vmem:[#allocation2 + $0x40] sm:$0xff]  ;;  %v658_v15 = vadd.f32 %v657_v10, %v656_v6  ;;  %v661_v22 = vsel %vm25_vm0, %v637_v34, 0.0 }
 0x1f0   :  { %621 = vst.msk [vmem:[#allocation2 + $0x60] sm:$0xff] %vm25_vm0, %v605_v58  ;;  %v591_v16 = vmul.f32 %v553_v9, %v553_v9  ;;  %v659_v19 = vsel %vm25_vm0, %v636_v57, 0.0 }
 0x1f1   :  { %v608_v20 = vadd.f32 %v592_v13, %v576_v8  ;;  %v660_v33 = vadd.f32 %v659_v19, %v658_v15 }
 0x1f2   :  { %v607_v21 = vadd.f32 %v591_v16, %v575_v14  ;;  %v639_v24 = vld [vmem:[#allocation2 + $0x58] sm:$0xff] }
 0x1f3   :  { %624 = vst.msk [vmem:[#allocation2 + $0x78] sm:$0xff] %vm25_vm0, %v608_v20  ;;  %v638_v23 = vld [vmem:[#allocation2 + $0x50] sm:$0xff]  ;;  %v662_v27 = vadd.f32 %v661_v22, %v660_v33  ;;  %v665_v4 = vsel %vm25_vm0, %v639_v24, 0.0 }
 0x1f4   :  { %623 = vst.msk [vmem:[#allocation2 + $0x70] sm:$0xff] %vm25_vm0, %v607_v21  ;;  %v663_v7 = vsel %vm25_vm0, %v638_v23, 0.0 }
 0x1f5   :  { %v664_v28 = vadd.f32 %v663_v7, %v662_v27 }
 0x1f6   :  { %v641_v30 = vld [vmem:[#allocation2 + $0x68] sm:$0xff] }
 0x1f7   :  { %v640_v29 = vld [vmem:[#allocation2 + $0x60] sm:$0xff]  ;;  %v666_v12 = vadd.f32 %v665_v4, %v664_v28  ;;  %v669_v32 = vsel %vm25_vm0, %v641_v30, 0.0 }
 0x1f8   :  { %v667_v42 = vsel %vm25_vm0, %v640_v29, 0.0 }
 0x1f9   :  { %v668_v31 = vadd.f32 %v667_v42, %v666_v12 }
 0x1fa   :  { %v643_v36 = vld [vmem:[#allocation2 + $0x78] sm:$0xff] }
 0x1fb   :  { %v642_v35 = vld [vmem:[#allocation2 + $0x70] sm:$0xff]  ;;  %v670_v11 = vadd.f32 %v669_v32, %v668_v31  ;;  %v673_v39 = vsel %vm25_vm0, %v643_v36, 0.0 }
 0x1fc   :  { %v671_v41 = vsel %vm25_vm0, %v642_v35, 0.0 }
 0x1fd   :  { %v672_v37 = vadd.f32 %v671_v41, %v670_v11 }
 0x1ff   :  { %v674_v40 = vadd.f32 %v673_v39, %v672_v37 }
 0x201   :  { %675 = vadd.xlane.f32.xlu0 %v674_v40 }
 0x28e   :  { %v676_v43 = vpop.xlane.xlu0 %675 }
 0x28f   :  { %v677_v44 = vrot.slane %v676_v43, 4 }
 0x291   :  { %v678_v45 = vadd.f32 %v677_v44, %v676_v43 }
 0x293   :  { %v679_v46 = vrot.slane %v678_v45, 2 }
 0x295   :  { %v680_v47 = vadd.f32 %v679_v46, %v678_v45 }
 0x297   :  { %v681_v18 = vrot.slane %v680_v47, 1 }
 0x299   :  { %v682_v48 = vadd.f32 %v681_v18, %v680_v47 }
 0x29b   :  { %888 = vpush %v682_v48 }
 0x2cc   :  { %s889_s16 = spop %888 }
 0x2cd   :  { %s684_s17 = smul.f32 0.00048828125, %s889_s16 }
 0x2cf   :  { %v685_v49 = vstv %s684_s17 }
 0x2d0   :  { %687 = vst.msk [vmem:[#allocation3] sm:$0x1] %vm42_vm1, %v685_v49 }
 0x2d1   :  { %906 = shalt.err (!%p903_p4)
}
 0x2d2   :  { %s907_s21 = scalar_lea.hbm %s1314_s5, 16 }
 0x2d3   :  { %p908_p5 = scmp.ne.s32.totalorder %s1314_s5, %s907_s21  ;;  %p911_p6 = scmp.lt.u32.totalorder %s907_s21, %s1314_s5 }
 0x2d5   :  { %p913_p7 = pnand %p911_p6, %p908_p5 }
 0x2d7   :  { %916 = shalt.err (!%p913_p7)
}
 0x2d8   :  { %697 = dma.vmem_to_hbm [thread:$0]  %s695_s15, 16, %s1314_s5, [#allocation4]  }
 0x2d9   :  { %917 = dma.done.wait [#allocation4], 16  }
 0x2da   :  { %918 = vsyncadd [#allocation4], 4294967280 }
 0x2db   :  { %701 = vsyncpa [#allocation4], 1 }

</bundles_post_ra>
